<compile_context>
chip_gen: v6e
topology: v6e:2x2x1
jax: 0.10.0
libtpu: 0.0.40
codegen_flags: <defaults>
</compile_context>

<pallas_src>
import jax
import jax.numpy as jnp
from jax import lax
from jax.experimental import pallas as pl
from jax.experimental.pallas import tpu as pltpu


def encoder_kernel(x_ref, meta_ref, wx_ref, wm_ref, wh_ref, bc_ref, bhn_ref,
                   w1_ref, b1_ref, w2_ref, b2_ref, out_ref, gx_ref):
    """GRU recurrence + FC head on one TensorCore.

    x_ref    : (S*B, Din)  time-major, flattened (t-major, batch-minor) input
    meta_ref : (B, Dm)     per-sequence meta features (zeros column if none)
    wx_ref   : (Din, 3H)   gate-packed input weights (columns r | z | n)
    wm_ref   : (Dm, 3H)    gate-packed meta weights
    wh_ref   : (H, 3H)     gate-packed hidden weights
    bc_ref   : (1, 3H)     fused bias (b_ih_r+b_hh_r | b_ih_z+b_hh_z | b_ih_n)
    bhn_ref  : (1, H)      b_hh_n (must stay inside r * (Wh_n h + b_hn))
    w1_ref   : (H, H), b1_ref: (1, H)      first FC layer
    w2_ref   : (H, P), b2_ref: (1, P)      second FC layer, lane-padded (P >= 2H)
    out_ref  : (B, P)      [mean | std | zero-pad]
    gx_ref   : (S, B, 3H)  VMEM scratch: hoisted projection + time-invariant terms
    """
    S, B, _ = gx_ref.shape
    H = wh_ref.shape[0]

    # ---- Hoisted, gate-packed input projection: ONE lane-dense MXU op for all
    # timesteps, plus one meta matmul for the time-invariant contribution. ----
    gx = jnp.dot(x_ref[...], wx_ref[...], preferred_element_type=jnp.float32)   # (S*B, 3H)
    c = (jnp.dot(meta_ref[...], wm_ref[...], preferred_element_type=jnp.float32)
         + bc_ref[...])                                                          # (B, 3H)
    # Stage in VMEM scratch (so the recurrence does not keep the whole projection
    # live in vregs) and fold the time-invariant term in once.
    gx_ref[...] = gx.reshape(S, B, gx.shape[1]) + c[None, :, :]

    # Hoist the b_hh_n broadcast out of the loop (JAX does not CSE broadcasts).
    bhn = jnp.zeros((B, H), jnp.float32) + bhn_ref[...]                          # (B, H)
    wh = wh_ref[...]                                                             # (H, 3H)

    def step(t, h):
        a = gx_ref[t]                                                    # (B, 3H), one vld
        gh = jnp.dot(h, wh, preferred_element_type=jnp.float32)          # single MXU op/step
        r = jax.nn.sigmoid(a[:, :H] + gh[:, :H])
        z = jax.nn.sigmoid(a[:, H:2 * H] + gh[:, H:2 * H])
        n = jnp.tanh(a[:, 2 * H:] + r * (gh[:, 2 * H:] + bhn))
        return (1.0 - z) * n + z * h

    # Bounded unroll: keeps LLO scheduling visibility while capping vreg pressure.
    h = lax.fori_loop(0, S, step, jnp.zeros((B, H), jnp.float32),
                      unroll=True if S <= 8 else 4)

    # ---- FC head: Linear -> ReLU -> Linear (lane-padded output => unmasked vst) ----
    h1 = jnp.maximum(
        jnp.dot(h, w1_ref[...], preferred_element_type=jnp.float32) + b1_ref[...],
        0.0)
    out_ref[...] = (jnp.dot(h1, w2_ref[...], preferred_element_type=jnp.float32)
                    + b2_ref[...])


def init_params(key, input_dim, meta_dim, hidden_dim):
    """PyTorch-shaped synthetic params (nn.GRU / nn.Linear layouts)."""
    D = input_dim + meta_dim
    H = hidden_dim
    ks = jax.random.split(key, 8)
    s = 1.0 / jnp.sqrt(H)
    u = lambda k, shape: jax.random.uniform(k, shape, jnp.float32, -s, s)
    return {
        "weight_ih": u(ks[0], (3 * H, D)),   # gate order r, z, n (PyTorch)
        "weight_hh": u(ks[1], (3 * H, H)),
        "bias_ih": u(ks[2], (3 * H,)),
        "bias_hh": u(ks[3], (3 * H,)),
        "fc1_w": u(ks[4], (H, H)),
        "fc1_b": u(ks[5], (H,)),
        "fc2_w": u(ks[6], (2 * H, H)),
        "fc2_b": u(ks[7], (2 * H,)),
    }


def prepare_params(params, input_dim):
    """PyTorch-layout params -> kernel's gate-packed, transposed layout.

    Call ONCE at parameter-load time (hoisted out of the forward pass).
    """
    H = params["weight_hh"].shape[1]
    w_ih = params["weight_ih"].T.astype(jnp.float32)     # (D, 3H), columns r | z | n
    wx = w_ih[:input_dim, :]                             # (Din, 3H)
    wm = w_ih[input_dim:, :]                             # (Dm, 3H)
    if wm.shape[0] == 0:                                 # meta_dim == 0: dummy row
        wm = jnp.zeros((1, 3 * H), jnp.float32)
    wh = params["weight_hh"].T.astype(jnp.float32)       # (H, 3H)

    b_ih = params["bias_ih"].astype(jnp.float32)
    b_hh = params["bias_hh"].astype(jnp.float32)
    # Fuse biases host-side: r/z hidden biases fold fully; b_hh_n stays separate.
    bc = jnp.concatenate([b_ih[:2 * H] + b_hh[:2 * H], b_ih[2 * H:]]).reshape(1, 3 * H)
    bhn = b_hh[2 * H:].reshape(1, H)

    w1 = params["fc1_w"].T.astype(jnp.float32)           # (H, H)
    b1 = params["fc1_b"].astype(jnp.float32).reshape(1, H)

    out_pad = ((2 * H + 127) // 128) * 128                # lane-dense output width
    w2 = jnp.zeros((H, out_pad), jnp.float32).at[:, :2 * H].set(
        params["fc2_w"].T.astype(jnp.float32))
    b2 = jnp.zeros((1, out_pad), jnp.float32).at[:, :2 * H].set(
        params["fc2_b"].astype(jnp.float32))

    return {"wx": wx, "wm": wm, "wh": wh, "bc": bc, "bhn": bhn,
            "w1": w1, "b1": b1, "w2": w2, "b2": b2}


def encoder_forward(x, meta, kp):
    """x: (B, S, input_dim), meta: (B, meta_dim) or None, kp: prepare_params output.

    Returns (mean, std), each (B, hidden_dim).
    """
    B, S, input_dim = x.shape
    H = kp["wh"].shape[0]
    Dm = kp["wm"].shape[0]
    out_pad = kp["w2"].shape[1]

    if meta is None or meta.shape[-1] == 0:
        meta = jnp.zeros((B, Dm), jnp.float32)

    # Pad batch to a sublane multiple (8): whole-tile per-step slices, no shuffles.
    Bp = ((B + 7) // 8) * 8
    x_p = jnp.zeros((Bp, S, input_dim), jnp.float32).at[:B].set(x.astype(jnp.float32))
    m_p = jnp.zeros((Bp, Dm), jnp.float32).at[:B].set(meta.astype(jnp.float32))
    # Time-major, flattened: row t*Bp + b  ==  (timestep t, batch b).
    x_flat = jnp.transpose(x_p, (1, 0, 2)).reshape(S * Bp, input_dim)

    # Grid-less: all operands are a few KB and live fully in VMEM.
    # For large B on v7x, add a batch grid axis with
    # dimension_semantics=("parallel",) to shard over both TensorCores; for large
    # S*B, chunk the time axis and set vmem_limit_bytes (v7x has 64 MiB VMEM).
    out = pl.pallas_call(
        encoder_kernel,
        out_shape=jax.ShapeDtypeStruct((Bp, out_pad), jnp.float32),
        in_specs=[pl.BlockSpec(memory_space=pltpu.VMEM)] * 11,
        out_specs=pl.BlockSpec(memory_space=pltpu.VMEM),
        scratch_shapes=[pltpu.VMEM((S, Bp, 3 * H), jnp.float32)],
    )(x_flat, m_p, kp["wx"], kp["wm"], kp["wh"], kp["bc"], kp["bhn"],
      kp["w1"], kp["b1"], kp["w2"], kp["b2"])

    mean = out[:B, :H]
    std = out[:B, H:2 * H]
    return mean, std


def reference_forward(x, meta, params):
    """Pure-JAX reference mirroring the PyTorch module, for verification."""
    H = params["weight_hh"].shape[1]
    if meta is not None:
        meta_t = jnp.tile(meta[:, None, :], (1, x.shape[1], 1))
        xc = jnp.concatenate([x, meta_t], axis=-1)
    else:
        xc = x
    B, S, _ = xc.shape
    w_ih = params["weight_ih"].T
    w_hh = params["weight_hh"].T
    b_ih = params["bias_ih"]
    b_hh = params["bias_hh"]
    h = jnp.zeros((B, H), jnp.float32)
    for t in range(S):
        gi = xc[:, t, :] @ w_ih + b_ih
        gh = h @ w_hh + b_hh
        r = jax.nn.sigmoid(gi[:, :H] + gh[:, :H])
        z = jax.nn.sigmoid(gi[:, H:2 * H] + gh[:, H:2 * H])
        n = jnp.tanh(gi[:, 2 * H:] + r * gh[:, 2 * H:])
        h = (1.0 - z) * n + z * h
    h1 = jnp.maximum(h @ params["fc1_w"].T + params["fc1_b"], 0.0)
    out = h1 @ params["fc2_w"].T + params["fc2_b"]
    return out[:, :H], out[:, H:]


if __name__ == "__main__":
    input_dim, meta_dim, hidden_dim = 6, 2, 32
    batch, seq = 4, 8

    key = jax.random.PRNGKey(0)
    kx, km, kparam = jax.random.split(key, 3)
    x = jax.random.normal(kx, (batch, seq, input_dim), jnp.float32)
    meta = jax.random.normal(km, (batch, meta_dim), jnp.float32)
    params = init_params(kparam, input_dim, meta_dim, hidden_dim)

    kp = prepare_params(params, input_dim)   # hoisted: once at param-load time
    mean, std = encoder_forward(x, meta, kp)
    mean = jax.block_until_ready(mean)
    std = jax.block_until_ready(std)

    ref_mean, ref_std = reference_forward(x, meta, params)
    assert mean.shape == (batch, hidden_dim) and std.shape == (batch, hidden_dim)
    assert jnp.allclose(mean, ref_mean, atol=1e-4, rtol=1e-4)
    assert jnp.allclose(std, ref_std, atol=1e-4, rtol=1e-4)

    # TODO(synk): PyTorch spec returns the raw linear split (no softplus on std);
    # kernel and reference intentionally match that.
    print("KERNEL_OK")
</pallas_src>

<mosaic_0001>
module attributes {stable_mosaic.version = 11 : i64} {
  func.func @encoder_kernel(%arg0: memref<64x6xf32, #tpu.memory_space<vmem>>, %arg1: memref<8x2xf32, #tpu.memory_space<vmem>>, %arg2: memref<6x96xf32, #tpu.memory_space<vmem>>, %arg3: memref<2x96xf32, #tpu.memory_space<vmem>>, %arg4: memref<32x96xf32, #tpu.memory_space<vmem>>, %arg5: memref<1x96xf32, #tpu.memory_space<vmem>>, %arg6: memref<1x32xf32, #tpu.memory_space<vmem>>, %arg7: memref<32x32xf32, #tpu.memory_space<vmem>>, %arg8: memref<1x32xf32, #tpu.memory_space<vmem>>, %arg9: memref<32x128xf32, #tpu.memory_space<vmem>>, %arg10: memref<1x128xf32, #tpu.memory_space<vmem>>, %arg11: memref<8x128xf32, #tpu.memory_space<vmem>>, %arg12: memref<8x8x96xf32, #tpu.memory_space<vmem>>) attributes {dimension_semantics = [], scalar_prefetch = 0 : i64, scratch_operands = 1 : i64, tpu.core_type = #tpu.core_type<tc>} {
    %c0 = arith.constant 0 : index
    %c0_0 = arith.constant 0 : index
    %0 = vector.load %arg0[%c0, %c0_0] : memref<64x6xf32, #tpu.memory_space<vmem>>, vector<64x6xf32>
    %c0_1 = arith.constant 0 : index
    %c0_2 = arith.constant 0 : index
    %1 = vector.load %arg2[%c0_1, %c0_2] : memref<6x96xf32, #tpu.memory_space<vmem>>, vector<6x96xf32>
    %cst = arith.constant dense<0.000000e+00> : vector<64x96xf32>
    %2 = tpu.matmul %0, %1, %cst {dimension_numbers = #tpu.dot_dimension_numbers<[1], [0], [0], [1], [0, 0, 1, 1], [], []>} : vector<64x6xf32>, vector<6x96xf32>, vector<64x96xf32> -> vector<64x96xf32>
    %c0_3 = arith.constant 0 : index
    %c0_4 = arith.constant 0 : index
    %3 = vector.load %arg1[%c0_3, %c0_4] : memref<8x2xf32, #tpu.memory_space<vmem>>, vector<8x2xf32>
    %c0_5 = arith.constant 0 : index
    %c0_6 = arith.constant 0 : index
    %4 = vector.load %arg3[%c0_5, %c0_6] : memref<2x96xf32, #tpu.memory_space<vmem>>, vector<2x96xf32>
    %cst_7 = arith.constant dense<0.000000e+00> : vector<8x96xf32>
    %5 = tpu.matmul %3, %4, %cst_7 {dimension_numbers = #tpu.dot_dimension_numbers<[1], [0], [0], [1], [0, 0, 1, 1], [], []>} : vector<8x2xf32>, vector<2x96xf32>, vector<8x96xf32> -> vector<8x96xf32>
    %c0_8 = arith.constant 0 : index
    %c0_9 = arith.constant 0 : index
    %6 = vector.load %arg5[%c0_8, %c0_9] : memref<1x96xf32, #tpu.memory_space<vmem>>, vector<1x96xf32>
    %7 = vector.broadcast %6 : vector<1x96xf32> to vector<8x96xf32>
    %8 = arith.addf %5, %7 : vector<8x96xf32>
    %9 = vector.shape_cast %2 : vector<64x96xf32> to vector<8x8x96xf32>
    %10 = vector.shape_cast %8 : vector<8x96xf32> to vector<1x8x96xf32>
    %11 = vector.broadcast %10 : vector<1x8x96xf32> to vector<8x8x96xf32>
    %12 = arith.addf %9, %11 : vector<8x8x96xf32>
    %c0_10 = arith.constant 0 : index
    %c0_11 = arith.constant 0 : index
    %c0_12 = arith.constant 0 : index
    %13 = vector.load %arg12[%c0_10, %c0_11, %c0_12] : memref<8x8x96xf32, #tpu.memory_space<vmem>>, vector<8x8x96xf32>
    tpu.vector_store %arg12[%c0_10, %c0_11, %c0_12], %12 {strides = array<i32>} : memref<8x8x96xf32, #tpu.memory_space<vmem>>, vector<8x8x96xf32>,
    %cst_13 = arith.constant 0.000000e+00 : f32
    %14 = vector.broadcast %cst_13 : f32 to vector<8x32xf32>
    %c0_14 = arith.constant 0 : index
    %c0_15 = arith.constant 0 : index
    %15 = vector.load %arg6[%c0_14, %c0_15] : memref<1x32xf32, #tpu.memory_space<vmem>>, vector<1x32xf32>
    %16 = vector.broadcast %15 : vector<1x32xf32> to vector<8x32xf32>
    %17 = arith.addf %14, %16 : vector<8x32xf32>
    %c0_16 = arith.constant 0 : index
    %c0_17 = arith.constant 0 : index
    %18 = vector.load %arg4[%c0_16, %c0_17] : memref<32x96xf32, #tpu.memory_space<vmem>>, vector<32x96xf32>
    %cst_18 = arith.constant 0.000000e+00 : f32
    %19 = vector.broadcast %cst_18 : f32 to vector<8x32xf32>
    %c0_i32 = arith.constant 0 : i32
    %20 = arith.index_cast %c0_i32 : i32 to index
    %c0_19 = arith.constant 0 : index
    %c0_20 = arith.constant 0 : index
    %21 = vector.load %arg12[%20, %c0_19, %c0_20] : memref<8x8x96xf32, #tpu.memory_space<vmem>>, vector<1x8x96xf32>
    %22 = vector.shape_cast %21 : vector<1x8x96xf32> to vector<8x96xf32>
    %cst_21 = arith.constant dense<0.000000e+00> : vector<8x96xf32>
    %23 = tpu.matmul %19, %18, %cst_21 {dimension_numbers = #tpu.dot_dimension_numbers<[1], [0], [0], [1], [0, 0, 1, 1], [], []>} : vector<8x32xf32>, vector<32x96xf32>, vector<8x96xf32> -> vector<8x96xf32>
    %24 = vector.extract_strided_slice %22 {offsets = [0, 0], sizes = [8, 32], strides = [1, 1]} : vector<8x96xf32> to vector<8x32xf32>
    %25 = vector.extract_strided_slice %23 {offsets = [0, 0], sizes = [8, 32], strides = [1, 1]} : vector<8x96xf32> to vector<8x32xf32>
    %26 = arith.addf %24, %25 : vector<8x32xf32>
    %27 = arith.negf %26 : vector<8x32xf32>
    %28 = math.exp %27 : vector<8x32xf32>
    %cst_22 = arith.constant 1.000000e+00 : f32
    %29 = vector.broadcast %cst_22 : f32 to vector<8x32xf32>
    %30 = arith.addf %29, %28 : vector<8x32xf32>
    %31 = arith.divf %29, %30 : vector<8x32xf32>
    %32 = vector.extract_strided_slice %22 {offsets = [0, 32], sizes = [8, 32], strides = [1, 1]} : vector<8x96xf32> to vector<8x32xf32>
    %33 = vector.extract_strided_slice %23 {offsets = [0, 32], sizes = [8, 32], strides = [1, 1]} : vector<8x96xf32> to vector<8x32xf32>
    %34 = arith.addf %32, %33 : vector<8x32xf32>
    %35 = arith.negf %34 : vector<8x32xf32>
    %36 = math.exp %35 : vector<8x32xf32>
    %cst_23 = arith.constant 1.000000e+00 : f32
    %37 = vector.broadcast %cst_23 : f32 to vector<8x32xf32>
    %38 = arith.addf %37, %36 : vector<8x32xf32>
    %39 = arith.divf %37, %38 : vector<8x32xf32>
    %40 = vector.extract_strided_slice %22 {offsets = [0, 64], sizes = [8, 32], strides = [1, 1]} : vector<8x96xf32> to vector<8x32xf32>
    %41 = vector.extract_strided_slice %23 {offsets = [0, 64], sizes = [8, 32], strides = [1, 1]} : vector<8x96xf32> to vector<8x32xf32>
    %42 = arith.addf %41, %17 : vector<8x32xf32>
    %43 = arith.mulf %31, %42 : vector<8x32xf32>
    %44 = arith.addf %40, %43 : vector<8x32xf32>
    %45 = math.tanh %44 : vector<8x32xf32>
    %cst_24 = arith.constant 1.000000e+00 : f32
    %46 = vector.broadcast %cst_24 : f32 to vector<8x32xf32>
    %47 = arith.subf %46, %39 : vector<8x32xf32>
    %48 = arith.mulf %47, %45 : vector<8x32xf32>
    %49 = arith.mulf %39, %19 : vector<8x32xf32>
    %50 = arith.addf %48, %49 : vector<8x32xf32>
    %c1_i32 = arith.constant 1 : i32
    %51 = arith.index_cast %c1_i32 : i32 to index
    %c0_25 = arith.constant 0 : index
    %c0_26 = arith.constant 0 : index
    %52 = vector.load %arg12[%51, %c0_25, %c0_26] : memref<8x8x96xf32, #tpu.memory_space<vmem>>, vector<1x8x96xf32>
    %53 = vector.shape_cast %52 : vector<1x8x96xf32> to vector<8x96xf32>
    %cst_27 = arith.constant dense<0.000000e+00> : vector<8x96xf32>
    %54 = tpu.matmul %50, %18, %cst_27 {dimension_numbers = #tpu.dot_dimension_numbers<[1], [0], [0], [1], [0, 0, 1, 1], [], []>} : vector<8x32xf32>, vector<32x96xf32>, vector<8x96xf32> -> vector<8x96xf32>
    %55 = vector.extract_strided_slice %53 {offsets = [0, 0], sizes = [8, 32], strides = [1, 1]} : vector<8x96xf32> to vector<8x32xf32>
    %56 = vector.extract_strided_slice %54 {offsets = [0, 0], sizes = [8, 32], strides = [1, 1]} : vector<8x96xf32> to vector<8x32xf32>
    %57 = arith.addf %55, %56 : vector<8x32xf32>
    %58 = arith.negf %57 : vector<8x32xf32>
    %59 = math.exp %58 : vector<8x32xf32>
    %cst_28 = arith.constant 1.000000e+00 : f32
    %60 = vector.broadcast %cst_28 : f32 to vector<8x32xf32>
    %61 = arith.addf %60, %59 : vector<8x32xf32>
    %62 = arith.divf %60, %61 : vector<8x32xf32>
    %63 = vector.extract_strided_slice %53 {offsets = [0, 32], sizes = [8, 32], strides = [1, 1]} : vector<8x96xf32> to vector<8x32xf32>
    %64 = vector.extract_strided_slice %54 {offsets = [0, 32], sizes = [8, 32], strides = [1, 1]} : vector<8x96xf32> to vector<8x32xf32>
    %65 = arith.addf %63, %64 : vector<8x32xf32>
    %66 = arith.negf %65 : vector<8x32xf32>
    %67 = math.exp %66 : vector<8x32xf32>
    %cst_29 = arith.constant 1.000000e+00 : f32
    %68 = vector.broadcast %cst_29 : f32 to vector<8x32xf32>
    %69 = arith.addf %68, %67 : vector<8x32xf32>
    %70 = arith.divf %68, %69 : vector<8x32xf32>
    %71 = vector.extract_strided_slice %53 {offsets = [0, 64], sizes = [8, 32], strides = [1, 1]} : vector<8x96xf32> to vector<8x32xf32>
    %72 = vector.extract_strided_slice %54 {offsets = [0, 64], sizes = [8, 32], strides = [1, 1]} : vector<8x96xf32> to vector<8x32xf32>
    %73 = arith.addf %72, %17 : vector<8x32xf32>
    %74 = arith.mulf %62, %73 : vector<8x32xf32>
    %75 = arith.addf %71, %74 : vector<8x32xf32>
    %76 = math.tanh %75 : vector<8x32xf32>
    %cst_30 = arith.constant 1.000000e+00 : f32
    %77 = vector.broadcast %cst_30 : f32 to vector<8x32xf32>
    %78 = arith.subf %77, %70 : vector<8x32xf32>
    %79 = arith.mulf %78, %76 : vector<8x32xf32>
    %80 = arith.mulf %70, %50 : vector<8x32xf32>
    %81 = arith.addf %79, %80 : vector<8x32xf32>
    %c2_i32 = arith.constant 2 : i32
    %82 = arith.index_cast %c2_i32 : i32 to index
    %c0_31 = arith.constant 0 : index
    %c0_32 = arith.constant 0 : index
    %83 = vector.load %arg12[%82, %c0_31, %c0_32] : memref<8x8x96xf32, #tpu.memory_space<vmem>>, vector<1x8x96xf32>
    %84 = vector.shape_cast %83 : vector<1x8x96xf32> to vector<8x96xf32>
    %cst_33 = arith.constant dense<0.000000e+00> : vector<8x96xf32>
    %85 = tpu.matmul %81, %18, %cst_33 {dimension_numbers = #tpu.dot_dimension_numbers<[1], [0], [0], [1], [0, 0, 1, 1], [], []>} : vector<8x32xf32>, vector<32x96xf32>, vector<8x96xf32> -> vector<8x96xf32>
    %86 = vector.extract_strided_slice %84 {offsets = [0, 0], sizes = [8, 32], strides = [1, 1]} : vector<8x96xf32> to vector<8x32xf32>
    %87 = vector.extract_strided_slice %85 {offsets = [0, 0], sizes = [8, 32], strides = [1, 1]} : vector<8x96xf32> to vector<8x32xf32>
    %88 = arith.addf %86, %87 : vector<8x32xf32>
    %89 = arith.negf %88 : vector<8x32xf32>
    %90 = math.exp %89 : vector<8x32xf32>
    %cst_34 = arith.constant 1.000000e+00 : f32
    %91 = vector.broadcast %cst_34 : f32 to vector<8x32xf32>
    %92 = arith.addf %91, %90 : vector<8x32xf32>
    %93 = arith.divf %91, %92 : vector<8x32xf32>
    %94 = vector.extract_strided_slice %84 {offsets = [0, 32], sizes = [8, 32], strides = [1, 1]} : vector<8x96xf32> to vector<8x32xf32>
    %95 = vector.extract_strided_slice %85 {offsets = [0, 32], sizes = [8, 32], strides = [1, 1]} : vector<8x96xf32> to vector<8x32xf32>
    %96 = arith.addf %94, %95 : vector<8x32xf32>
    %97 = arith.negf %96 : vector<8x32xf32>
    %98 = math.exp %97 : vector<8x32xf32>
    %cst_35 = arith.constant 1.000000e+00 : f32
    %99 = vector.broadcast %cst_35 : f32 to vector<8x32xf32>
    %100 = arith.addf %99, %98 : vector<8x32xf32>
    %101 = arith.divf %99, %100 : vector<8x32xf32>
    %102 = vector.extract_strided_slice %84 {offsets = [0, 64], sizes = [8, 32], strides = [1, 1]} : vector<8x96xf32> to vector<8x32xf32>
    %103 = vector.extract_strided_slice %85 {offsets = [0, 64], sizes = [8, 32], strides = [1, 1]} : vector<8x96xf32> to vector<8x32xf32>
    %104 = arith.addf %103, %17 : vector<8x32xf32>
    %105 = arith.mulf %93, %104 : vector<8x32xf32>
    %106 = arith.addf %102, %105 : vector<8x32xf32>
    %107 = math.tanh %106 : vector<8x32xf32>
    %cst_36 = arith.constant 1.000000e+00 : f32
    %108 = vector.broadcast %cst_36 : f32 to vector<8x32xf32>
    %109 = arith.subf %108, %101 : vector<8x32xf32>
    %110 = arith.mulf %109, %107 : vector<8x32xf32>
    %111 = arith.mulf %101, %81 : vector<8x32xf32>
    %112 = arith.addf %110, %111 : vector<8x32xf32>
    %c3_i32 = arith.constant 3 : i32
    %113 = arith.index_cast %c3_i32 : i32 to index
    %c0_37 = arith.constant 0 : index
    %c0_38 = arith.constant 0 : index
    %114 = vector.load %arg12[%113, %c0_37, %c0_38] : memref<8x8x96xf32, #tpu.memory_space<vmem>>, vector<1x8x96xf32>
    %115 = vector.shape_cast %114 : vector<1x8x96xf32> to vector<8x96xf32>
    %cst_39 = arith.constant dense<0.000000e+00> : vector<8x96xf32>
    %116 = tpu.matmul %112, %18, %cst_39 {dimension_numbers = #tpu.dot_dimension_numbers<[1], [0], [0], [1], [0, 0, 1, 1], [], []>} : vector<8x32xf32>, vector<32x96xf32>, vector<8x96xf32> -> vector<8x96xf32>
    %117 = vector.extract_strided_slice %115 {offsets = [0, 0], sizes = [8, 32], strides = [1, 1]} : vector<8x96xf32> to vector<8x32xf32>
    %118 = vector.extract_strided_slice %116 {offsets = [0, 0], sizes = [8, 32], strides = [1, 1]} : vector<8x96xf32> to vector<8x32xf32>
    %119 = arith.addf %117, %118 : vector<8x32xf32>
    %120 = arith.negf %119 : vector<8x32xf32>
    %121 = math.exp %120 : vector<8x32xf32>
    %cst_40 = arith.constant 1.000000e+00 : f32
    %122 = vector.broadcast %cst_40 : f32 to vector<8x32xf32>
    %123 = arith.addf %122, %121 : vector<8x32xf32>
    %124 = arith.divf %122, %123 : vector<8x32xf32>
    %125 = vector.extract_strided_slice %115 {offsets = [0, 32], sizes = [8, 32], strides = [1, 1]} : vector<8x96xf32> to vector<8x32xf32>
    %126 = vector.extract_strided_slice %116 {offsets = [0, 32], sizes = [8, 32], strides = [1, 1]} : vector<8x96xf32> to vector<8x32xf32>
    %127 = arith.addf %125, %126 : vector<8x32xf32>
    %128 = arith.negf %127 : vector<8x32xf32>
    %129 = math.exp %128 : vector<8x32xf32>
    %cst_41 = arith.constant 1.000000e+00 : f32
    %130 = vector.broadcast %cst_41 : f32 to vector<8x32xf32>
    %131 = arith.addf %130, %129 : vector<8x32xf32>
    %132 = arith.divf %130, %131 : vector<8x32xf32>
    %133 = vector.extract_strided_slice %115 {offsets = [0, 64], sizes = [8, 32], strides = [1, 1]} : vector<8x96xf32> to vector<8x32xf32>
    %134 = vector.extract_strided_slice %116 {offsets = [0, 64], sizes = [8, 32], strides = [1, 1]} : vector<8x96xf32> to vector<8x32xf32>
    %135 = arith.addf %134, %17 : vector<8x32xf32>
    %136 = arith.mulf %124, %135 : vector<8x32xf32>
    %137 = arith.addf %133, %136 : vector<8x32xf32>
    %138 = math.tanh %137 : vector<8x32xf32>
    %cst_42 = arith.constant 1.000000e+00 : f32
    %139 = vector.broadcast %cst_42 : f32 to vector<8x32xf32>
    %140 = arith.subf %139, %132 : vector<8x32xf32>
    %141 = arith.mulf %140, %138 : vector<8x32xf32>
    %142 = arith.mulf %132, %112 : vector<8x32xf32>
    %143 = arith.addf %141, %142 : vector<8x32xf32>
    %c4_i32 = arith.constant 4 : i32
    %144 = arith.index_cast %c4_i32 : i32 to index
    %c0_43 = arith.constant 0 : index
    %c0_44 = arith.constant 0 : index
    %145 = vector.load %arg12[%144, %c0_43, %c0_44] : memref<8x8x96xf32, #tpu.memory_space<vmem>>, vector<1x8x96xf32>
    %146 = vector.shape_cast %145 : vector<1x8x96xf32> to vector<8x96xf32>
    %cst_45 = arith.constant dense<0.000000e+00> : vector<8x96xf32>
    %147 = tpu.matmul %143, %18, %cst_45 {dimension_numbers = #tpu.dot_dimension_numbers<[1], [0], [0], [1], [0, 0, 1, 1], [], []>} : vector<8x32xf32>, vector<32x96xf32>, vector<8x96xf32> -> vector<8x96xf32>
    %148 = vector.extract_strided_slice %146 {offsets = [0, 0], sizes = [8, 32], strides = [1, 1]} : vector<8x96xf32> to vector<8x32xf32>
    %149 = vector.extract_strided_slice %147 {offsets = [0, 0], sizes = [8, 32], strides = [1, 1]} : vector<8x96xf32> to vector<8x32xf32>
    %150 = arith.addf %148, %149 : vector<8x32xf32>
    %151 = arith.negf %150 : vector<8x32xf32>
    %152 = math.exp %151 : vector<8x32xf32>
    %cst_46 = arith.constant 1.000000e+00 : f32
    %153 = vector.broadcast %cst_46 : f32 to vector<8x32xf32>
    %154 = arith.addf %153, %152 : vector<8x32xf32>
    %155 = arith.divf %153, %154 : vector<8x32xf32>
    %156 = vector.extract_strided_slice %146 {offsets = [0, 32], sizes = [8, 32], strides = [1, 1]} : vector<8x96xf32> to vector<8x32xf32>
    %157 = vector.extract_strided_slice %147 {offsets = [0, 32], sizes = [8, 32], strides = [1, 1]} : vector<8x96xf32> to vector<8x32xf32>
    %158 = arith.addf %156, %157 : vector<8x32xf32>
    %159 = arith.negf %158 : vector<8x32xf32>
    %160 = math.exp %159 : vector<8x32xf32>
    %cst_47 = arith.constant 1.000000e+00 : f32
    %161 = vector.broadcast %cst_47 : f32 to vector<8x32xf32>
    %162 = arith.addf %161, %160 : vector<8x32xf32>
    %163 = arith.divf %161, %162 : vector<8x32xf32>
    %164 = vector.extract_strided_slice %146 {offsets = [0, 64], sizes = [8, 32], strides = [1, 1]} : vector<8x96xf32> to vector<8x32xf32>
    %165 = vector.extract_strided_slice %147 {offsets = [0, 64], sizes = [8, 32], strides = [1, 1]} : vector<8x96xf32> to vector<8x32xf32>
    %166 = arith.addf %165, %17 : vector<8x32xf32>
    %167 = arith.mulf %155, %166 : vector<8x32xf32>
    %168 = arith.addf %164, %167 : vector<8x32xf32>
    %169 = math.tanh %168 : vector<8x32xf32>
    %cst_48 = arith.constant 1.000000e+00 : f32
    %170 = vector.broadcast %cst_48 : f32 to vector<8x32xf32>
    %171 = arith.subf %170, %163 : vector<8x32xf32>
    %172 = arith.mulf %171, %169 : vector<8x32xf32>
    %173 = arith.mulf %163, %143 : vector<8x32xf32>
    %174 = arith.addf %172, %173 : vector<8x32xf32>
    %c5_i32 = arith.constant 5 : i32
    %175 = arith.index_cast %c5_i32 : i32 to index
    %c0_49 = arith.constant 0 : index
    %c0_50 = arith.constant 0 : index
    %176 = vector.load %arg12[%175, %c0_49, %c0_50] : memref<8x8x96xf32, #tpu.memory_space<vmem>>, vector<1x8x96xf32>
    %177 = vector.shape_cast %176 : vector<1x8x96xf32> to vector<8x96xf32>
    %cst_51 = arith.constant dense<0.000000e+00> : vector<8x96xf32>
    %178 = tpu.matmul %174, %18, %cst_51 {dimension_numbers = #tpu.dot_dimension_numbers<[1], [0], [0], [1], [0, 0, 1, 1], [], []>} : vector<8x32xf32>, vector<32x96xf32>, vector<8x96xf32> -> vector<8x96xf32>
    %179 = vector.extract_strided_slice %177 {offsets = [0, 0], sizes = [8, 32], strides = [1, 1]} : vector<8x96xf32> to vector<8x32xf32>
    %180 = vector.extract_strided_slice %178 {offsets = [0, 0], sizes = [8, 32], strides = [1, 1]} : vector<8x96xf32> to vector<8x32xf32>
    %181 = arith.addf %179, %180 : vector<8x32xf32>
    %182 = arith.negf %181 : vector<8x32xf32>
    %183 = math.exp %182 : vector<8x32xf32>
    %cst_52 = arith.constant 1.000000e+00 : f32
    %184 = vector.broadcast %cst_52 : f32 to vector<8x32xf32>
    %185 = arith.addf %184, %183 : vector<8x32xf32>
    %186 = arith.divf %184, %185 : vector<8x32xf32>
    %187 = vector.extract_strided_slice %177 {offsets = [0, 32], sizes = [8, 32], strides = [1, 1]} : vector<8x96xf32> to vector<8x32xf32>
    %188 = vector.extract_strided_slice %178 {offsets = [0, 32], sizes = [8, 32], strides = [1, 1]} : vector<8x96xf32> to vector<8x32xf32>
    %189 = arith.addf %187, %188 : vector<8x32xf32>
    %190 = arith.negf %189 : vector<8x32xf32>
    %191 = math.exp %190 : vector<8x32xf32>
    %cst_53 = arith.constant 1.000000e+00 : f32
    %192 = vector.broadcast %cst_53 : f32 to vector<8x32xf32>
    %193 = arith.addf %192, %191 : vector<8x32xf32>
    %194 = arith.divf %192, %193 : vector<8x32xf32>
    %195 = vector.extract_strided_slice %177 {offsets = [0, 64], sizes = [8, 32], strides = [1, 1]} : vector<8x96xf32> to vector<8x32xf32>
    %196 = vector.extract_strided_slice %178 {offsets = [0, 64], sizes = [8, 32], strides = [1, 1]} : vector<8x96xf32> to vector<8x32xf32>
    %197 = arith.addf %196, %17 : vector<8x32xf32>
    %198 = arith.mulf %186, %197 : vector<8x32xf32>
    %199 = arith.addf %195, %198 : vector<8x32xf32>
    %200 = math.tanh %199 : vector<8x32xf32>
    %cst_54 = arith.constant 1.000000e+00 : f32
    %201 = vector.broadcast %cst_54 : f32 to vector<8x32xf32>
    %202 = arith.subf %201, %194 : vector<8x32xf32>
    %203 = arith.mulf %202, %200 : vector<8x32xf32>
    %204 = arith.mulf %194, %174 : vector<8x32xf32>
    %205 = arith.addf %203, %204 : vector<8x32xf32>
    %c6_i32 = arith.constant 6 : i32
    %206 = arith.index_cast %c6_i32 : i32 to index
    %c0_55 = arith.constant 0 : index
    %c0_56 = arith.constant 0 : index
    %207 = vector.load %arg12[%206, %c0_55, %c0_56] : memref<8x8x96xf32, #tpu.memory_space<vmem>>, vector<1x8x96xf32>
    %208 = vector.shape_cast %207 : vector<1x8x96xf32> to vector<8x96xf32>
    %cst_57 = arith.constant dense<0.000000e+00> : vector<8x96xf32>
    %209 = tpu.matmul %205, %18, %cst_57 {dimension_numbers = #tpu.dot_dimension_numbers<[1], [0], [0], [1], [0, 0, 1, 1], [], []>} : vector<8x32xf32>, vector<32x96xf32>, vector<8x96xf32> -> vector<8x96xf32>
    %210 = vector.extract_strided_slice %208 {offsets = [0, 0], sizes = [8, 32], strides = [1, 1]} : vector<8x96xf32> to vector<8x32xf32>
    %211 = vector.extract_strided_slice %209 {offsets = [0, 0], sizes = [8, 32], strides = [1, 1]} : vector<8x96xf32> to vector<8x32xf32>
    %212 = arith.addf %210, %211 : vector<8x32xf32>
    %213 = arith.negf %212 : vector<8x32xf32>
    %214 = math.exp %213 : vector<8x32xf32>
    %cst_58 = arith.constant 1.000000e+00 : f32
    %215 = vector.broadcast %cst_58 : f32 to vector<8x32xf32>
    %216 = arith.addf %215, %214 : vector<8x32xf32>
    %217 = arith.divf %215, %216 : vector<8x32xf32>
    %218 = vector.extract_strided_slice %208 {offsets = [0, 32], sizes = [8, 32], strides = [1, 1]} : vector<8x96xf32> to vector<8x32xf32>
    %219 = vector.extract_strided_slice %209 {offsets = [0, 32], sizes = [8, 32], strides = [1, 1]} : vector<8x96xf32> to vector<8x32xf32>
    %220 = arith.addf %218, %219 : vector<8x32xf32>
    %221 = arith.negf %220 : vector<8x32xf32>
    %222 = math.exp %221 : vector<8x32xf32>
    %cst_59 = arith.constant 1.000000e+00 : f32
    %223 = vector.broadcast %cst_59 : f32 to vector<8x32xf32>
    %224 = arith.addf %223, %222 : vector<8x32xf32>
    %225 = arith.divf %223, %224 : vector<8x32xf32>
    %226 = vector.extract_strided_slice %208 {offsets = [0, 64], sizes = [8, 32], strides = [1, 1]} : vector<8x96xf32> to vector<8x32xf32>
    %227 = vector.extract_strided_slice %209 {offsets = [0, 64], sizes = [8, 32], strides = [1, 1]} : vector<8x96xf32> to vector<8x32xf32>
    %228 = arith.addf %227, %17 : vector<8x32xf32>
    %229 = arith.mulf %217, %228 : vector<8x32xf32>
    %230 = arith.addf %226, %229 : vector<8x32xf32>
    %231 = math.tanh %230 : vector<8x32xf32>
    %cst_60 = arith.constant 1.000000e+00 : f32
    %232 = vector.broadcast %cst_60 : f32 to vector<8x32xf32>
    %233 = arith.subf %232, %225 : vector<8x32xf32>
    %234 = arith.mulf %233, %231 : vector<8x32xf32>
    %235 = arith.mulf %225, %205 : vector<8x32xf32>
    %236 = arith.addf %234, %235 : vector<8x32xf32>
    %c7_i32 = arith.constant 7 : i32
    %237 = arith.index_cast %c7_i32 : i32 to index
    %c0_61 = arith.constant 0 : index
    %c0_62 = arith.constant 0 : index
    %238 = vector.load %arg12[%237, %c0_61, %c0_62] : memref<8x8x96xf32, #tpu.memory_space<vmem>>, vector<1x8x96xf32>
    %239 = vector.shape_cast %238 : vector<1x8x96xf32> to vector<8x96xf32>
    %cst_63 = arith.constant dense<0.000000e+00> : vector<8x96xf32>
    %240 = tpu.matmul %236, %18, %cst_63 {dimension_numbers = #tpu.dot_dimension_numbers<[1], [0], [0], [1], [0, 0, 1, 1], [], []>} : vector<8x32xf32>, vector<32x96xf32>, vector<8x96xf32> -> vector<8x96xf32>
    %241 = vector.extract_strided_slice %239 {offsets = [0, 0], sizes = [8, 32], strides = [1, 1]} : vector<8x96xf32> to vector<8x32xf32>
    %242 = vector.extract_strided_slice %240 {offsets = [0, 0], sizes = [8, 32], strides = [1, 1]} : vector<8x96xf32> to vector<8x32xf32>
    %243 = arith.addf %241, %242 : vector<8x32xf32>
    %244 = arith.negf %243 : vector<8x32xf32>
    %245 = math.exp %244 : vector<8x32xf32>
    %cst_64 = arith.constant 1.000000e+00 : f32
    %246 = vector.broadcast %cst_64 : f32 to vector<8x32xf32>
    %247 = arith.addf %246, %245 : vector<8x32xf32>
    %248 = arith.divf %246, %247 : vector<8x32xf32>
    %249 = vector.extract_strided_slice %239 {offsets = [0, 32], sizes = [8, 32], strides = [1, 1]} : vector<8x96xf32> to vector<8x32xf32>
    %250 = vector.extract_strided_slice %240 {offsets = [0, 32], sizes = [8, 32], strides = [1, 1]} : vector<8x96xf32> to vector<8x32xf32>
    %251 = arith.addf %249, %250 : vector<8x32xf32>
    %252 = arith.negf %251 : vector<8x32xf32>
    %253 = math.exp %252 : vector<8x32xf32>
    %cst_65 = arith.constant 1.000000e+00 : f32
    %254 = vector.broadcast %cst_65 : f32 to vector<8x32xf32>
    %255 = arith.addf %254, %253 : vector<8x32xf32>
    %256 = arith.divf %254, %255 : vector<8x32xf32>
    %257 = vector.extract_strided_slice %239 {offsets = [0, 64], sizes = [8, 32], strides = [1, 1]} : vector<8x96xf32> to vector<8x32xf32>
    %258 = vector.extract_strided_slice %240 {offsets = [0, 64], sizes = [8, 32], strides = [1, 1]} : vector<8x96xf32> to vector<8x32xf32>
    %259 = arith.addf %258, %17 : vector<8x32xf32>
    %260 = arith.mulf %248, %259 : vector<8x32xf32>
    %261 = arith.addf %257, %260 : vector<8x32xf32>
    %262 = math.tanh %261 : vector<8x32xf32>
    %cst_66 = arith.constant 1.000000e+00 : f32
    %263 = vector.broadcast %cst_66 : f32 to vector<8x32xf32>
    %264 = arith.subf %263, %256 : vector<8x32xf32>
    %265 = arith.mulf %264, %262 : vector<8x32xf32>
    %266 = arith.mulf %256, %236 : vector<8x32xf32>
    %267 = arith.addf %265, %266 : vector<8x32xf32>
    %c8_i32 = arith.constant 8 : i32
    %c0_67 = arith.constant 0 : index
    %c0_68 = arith.constant 0 : index
    %268 = vector.load %arg7[%c0_67, %c0_68] : memref<32x32xf32, #tpu.memory_space<vmem>>, vector<32x32xf32>
    %cst_69 = arith.constant dense<0.000000e+00> : vector<8x32xf32>
    %269 = tpu.matmul %267, %268, %cst_69 {dimension_numbers = #tpu.dot_dimension_numbers<[1], [0], [0], [1], [0, 0, 1, 1], [], []>} : vector<8x32xf32>, vector<32x32xf32>, vector<8x32xf32> -> vector<8x32xf32>
    %c0_70 = arith.constant 0 : index
    %c0_71 = arith.constant 0 : index
    %270 = vector.load %arg8[%c0_70, %c0_71] : memref<1x32xf32, #tpu.memory_space<vmem>>, vector<1x32xf32>
    %271 = vector.broadcast %270 : vector<1x32xf32> to vector<8x32xf32>
    %272 = arith.addf %269, %271 : vector<8x32xf32>
    %cst_72 = arith.constant 0.000000e+00 : f32
    %273 = vector.broadcast %cst_72 : f32 to vector<8x32xf32>
    %274 = arith.maximumf %272, %273 : vector<8x32xf32>
    %c0_73 = arith.constant 0 : index
    %c0_74 = arith.constant 0 : index
    %275 = vector.load %arg9[%c0_73, %c0_74] : memref<32x128xf32, #tpu.memory_space<vmem>>, vector<32x128xf32>
    %cst_75 = arith.constant dense<0.000000e+00> : vector<8x128xf32>
    %276 = tpu.matmul %274, %275, %cst_75 {dimension_numbers = #tpu.dot_dimension_numbers<[1], [0], [0], [1], [0, 0, 1, 1], [], []>} : vector<8x32xf32>, vector<32x128xf32>, vector<8x128xf32> -> vector<8x128xf32>
    %c0_76 = arith.constant 0 : index
    %c0_77 = arith.constant 0 : index
    %277 = vector.load %arg10[%c0_76, %c0_77] : memref<1x128xf32, #tpu.memory_space<vmem>>, vector<1x128xf32>
    %278 = vector.broadcast %277 : vector<1x128xf32> to vector<8x128xf32>
    %279 = arith.addf %276, %278 : vector<8x128xf32>
    %c0_78 = arith.constant 0 : index
    %c0_79 = arith.constant 0 : index
    %280 = vector.load %arg11[%c0_78, %c0_79] : memref<8x128xf32, #tpu.memory_space<vmem>>, vector<8x128xf32>
    tpu.vector_store %arg11[%c0_78, %c0_79], %279 {strides = array<i32>} : memref<8x128xf32, #tpu.memory_space<vmem>>, vector<8x128xf32>,
    return
  }
}

</mosaic_0001>

<bundles_post_ra>
// kernel: tpu_custom_call.1
= control target key start
LH: loop header
LB: loop body
LE: loop exit
PB: predicated region body
PF: predicated region fallthrough
CT: control target
= control target key end

     0   :  { %16 = vsyncpa [#allocation4], 0  ;;  %s2115_s0 = inlined_call_operand.vmem [shape: f32[64,6], index: 0, kind: input, shape index: {}]   ;;  %s2116_s1 = inlined_call_operand.vmem [shape: f32[8,2], index: 1, kind: input, shape index: {}]   ;;  %s2117_s2 = inlined_call_operand.hbm [shape: f32[6,96], index: 2, kind: input, shape index: {}]   ;;  %s2118_s3 = inlined_call_operand.hbm [shape: f32[2,96], index: 3, kind: input, shape index: {}]   ;;  %s2119_s4 = inlined_call_operand.vmem [shape: f32[32,96], index: 4, kind: input, shape index: {}]   ;;  %s2120_s5 = inlined_call_operand.hbm [shape: f32[1,96], index: 5, kind: input, shape index: {}]   ;;  %s2121_s6 = inlined_call_operand.hbm [shape: f32[1,32], index: 6, kind: input, shape index: {}]   ;;  %s2122_s7 = inlined_call_operand.vmem [shape: f32[32,32], index: 7, kind: input, shape index: {}]   ;;  %s2123_s8 = inlined_call_operand.hbm [shape: f32[1,32], index: 8, kind: input, shape index: {}]   ;;  %s2124_s9 = inlined_call_operand.vmem [shape: f32[32,128], index: 9, kind: input, shape index: {}]   ;;  %s2125_s10 = inlined_call_operand.vmem [shape: f32[1,128], index: 10, kind: input, shape index: {}]   ;;  %s2126_s11 = inlined_call_operand.hbm [shape: f32[8,128], index: 11, kind: output, shape index: {}]  }
   0x1   :  { %17 = vsyncpa [#allocation7], 0 }
   0x2   :  { %18 = vsyncpa [#allocation10], 0 }
   0x3   :  { %19 = vsyncpa [#allocation5], 0  ;;  %s1789_s17 = smov [#allocation6]   ;;  %s1790_s19 = smov [#allocation9]  }
   0x4   :  { %s40_s18 = sshll.u32 %s1789_s17, 4  ;;  %s62_s20 = sshll.u32 %s1790_s19, 4  ;;  %s41_s18 = int_to_ptr.vmem [resolvable:$true] %s40_s18  ;;  %s63_s20 = int_to_ptr.vmem [resolvable:$true] %s62_s20 }
   0x5   :  { %s1669_s21 = scalar_lea.vmem %s41_s18, 32  ;;  %p1674_p1 = scmp.lt.s32.totalorder %s41_s18, %s41_s18 }
   0x6   :  { %p1670_p0 = scmp.ne.s32.totalorder %s41_s18, %s1669_s21  ;;  %p1675_p2 = scmp.lt.s32.totalorder %s1669_s21, %s1669_s21 }
   0x8   :  { %p1676_p3 = por %p1675_p2, %p1674_p1 }
   0xa   :  { %p1677_p4 = pnand %p1676_p3, %p1670_p0 }
   0xc   :  { %1680 = shalt.err (!%p1677_p4)
}
   0xd   :  { %43 = dma.hbm_to_vmem [thread:$0]  %s2118_s3, 32, %s41_s18, [#allocation7]  }
   0xe   :  { %s1689_s24 = scalar_lea.vmem %s63_s20, 16  ;;  %s1693_s25 = scalar_lea.vmem %s63_s20, 32 }
   0xf   :  { %p1690_p5 = scmp.ne.s32.totalorder %s63_s20, %s1689_s24  ;;  %p1694_p6 = scmp.lt.s32.totalorder %s63_s20, %s63_s20 }
  0x10   :  { %p1695_p7 = scmp.lt.s32.totalorder %s1693_s25, %s1689_s24 }
  0x12   :  { %p1696_p8 = por %p1695_p7, %p1694_p6 }
  0x14   :  { %p1697_p9 = pnand %p1696_p8, %p1690_p5 }
  0x16   :  { %1700 = shalt.err (!%p1697_p9)
}
  0x17   :  { %65 = dma.hbm_to_vmem [thread:$0]  %s2121_s6, 16, %s63_s20, [#allocation10]  }
  0x18   :  { %s1791_s28 = smov [#allocation3]   ;;  %s1792_s30 = smov [#allocation8]  }
  0x19   :  { %s30_s29 = sshll.u32 %s1791_s28, 4  ;;  %s52_s12 = sshll.u32 %s1792_s30, 4  ;;  %s31_s29 = int_to_ptr.vmem [resolvable:$true] %s30_s29  ;;  %s53_s12 = int_to_ptr.vmem [resolvable:$true] %s52_s12 }
  0x1a   :  { %s1709_s13 = scalar_lea.vmem %s31_s29, 128  ;;  %p1714_p11 = scmp.lt.s32.totalorder %s31_s29, %s31_s29 }
  0x1b   :  { %p1710_p10 = scmp.ne.s32.totalorder %s31_s29, %s1709_s13  ;;  %p1715_p12 = scmp.lt.s32.totalorder %s1709_s13, %s1709_s13 }
  0x1d   :  { %p1716_p13 = por %p1715_p12, %p1714_p11 }
  0x1f   :  { %p1717_p0 = pnand %p1716_p13, %p1710_p10 }
  0x21   :  { %1720 = shalt.err (!%p1717_p0)
}
  0x22   :  { %33 = dma.hbm_to_vmem [thread:$0]  %s2117_s2, 128, %s31_s29, [#allocation4]  }
  0x23   :  { %s1729_s15 = scalar_lea.vmem %s53_s12, 16  ;;  %s1733_s6 = scalar_lea.vmem %s53_s12, 32 }
  0x24   :  { %p1730_p1 = scmp.ne.s32.totalorder %s53_s12, %s1729_s15  ;;  %p1734_p2 = scmp.lt.s32.totalorder %s53_s12, %s53_s12 }
  0x25   :  { %p1735_p3 = scmp.lt.s32.totalorder %s1733_s6, %s1729_s15 }
  0x27   :  { %p1736_p4 = por %p1735_p3, %p1734_p2 }
  0x29   :  { %p1737_p5 = pnand %p1736_p4, %p1730_p1 }
  0x2b   :  { %1740 = shalt.err (!%p1737_p5)
}
  0x2c   :  { %55 = dma.hbm_to_vmem [thread:$0]  %s2120_s5, 16, %s53_s12, [#allocation7]  }
  0x2d   :  { %s1793_s18 = smov [#allocation11]  }
  0x2e   :  { %s74_s19 = sshll.u32 %s1793_s18, 4  ;;  %s75_s19 = int_to_ptr.vmem [resolvable:$true] %s74_s19 }
  0x2f   :  { %s1749_s20 = scalar_lea.vmem %s75_s19, 16  ;;  %s1753_s21 = scalar_lea.vmem %s75_s19, 32 }
  0x30   :  { %p1750_p6 = scmp.ne.s32.totalorder %s75_s19, %s1749_s20  ;;  %p1754_p7 = scmp.lt.s32.totalorder %s75_s19, %s75_s19 }
  0x31   :  { %p1755_p8 = scmp.lt.s32.totalorder %s1753_s21, %s1749_s20 }
  0x33   :  { %p1756_p9 = por %p1755_p8, %p1754_p7 }
  0x35   :  { %p1757_p10 = pnand %p1756_p9, %p1750_p6 }
  0x37   :  { %1760 = shalt.err (!%p1757_p10)
}
  0x38   :  { %77 = dma.hbm_to_vmem [thread:$0]  %s2123_s8, 16, %s75_s19, [#allocation10]  }
  0x39   :  { %1781 = dma.done.wait [#allocation4], 128  }
  0x3a   :  { %1782 = vsyncadd [#allocation4], 4294967168 }
  0x3b   :  { %1783 = dma.done.wait [#allocation7], 48  }
  0x3c   :  { %1784 = vsyncadd [#allocation7], 4294967248 }
  0x3d   :  { %1785 = dma.done.wait [#allocation10], 32  }
  0x3e   :  { %1786 = vsyncadd [#allocation10], 4294967264  ;;  %vm131_vm0 = vcmask 1045504   ;;  %v105_v0 = vld [vmem:[#allocation3] sm:$0x3f]  ;;  %vm106_vm1 = vcmask 48128  }
  0x3f   :  { %v97_v1 = vld [vmem:[%s2115_s0] sm:$0xff]  ;;  %v103_v2 = vld [vmem:[%s2115_s0 + $0x30] sm:$0xff]  ;;  %1472 = vmatprep.subr.msk.mxu0 %vm131_vm0, %v105_v0  ;;  %1601 = vmatprep.subr.msk.mxu1 %vm131_vm0, %v105_v0  ;;  %v98_v3 = vld [vmem:[%s2115_s0 + $0x8] sm:$0xff]  ;;  %vm253_vm2 = vcmask 1041408   ;;  %v1794_v7 = vmov 0.0   ;;  %vm249_vm3 = vcmask 15360  }
  0x40   :  { %v104_v4 = vld [vmem:[%s2115_s0 + $0x38] sm:$0xff]  ;;  %1473 = vmatpush3.msk.msra.mxu0 %vm131_vm0, %v105_v0  ;;  %1602 = vmatpush3.msk.msra.mxu1 %vm131_vm0, %v105_v0  ;;  %v99_v5 = vld [vmem:[%s2115_s0 + $0x10] sm:$0xff]  ;;  %v241_v6 = vld [vmem:[#allocation6] sm:$0x3]  ;;  %vm1795_vm4 = vmmov 0   ;;  %s1796_s18 = smov 64  }
  0x41   :  { %1474 = vmatprep.mubr.msk.f32.mxu0 %vm106_vm1, %v97_v1  ;;  %1483 = vmatprep.mubr.msk.f32.mxu1 %vm106_vm1, %v103_v2  ;;  %v100_v8 = vld [vmem:[%s2115_s0 + $0x18] sm:$0xff]  ;;  %v240_v9 = vld [vmem:[%s2116_s1] sm:$0xff]  ;;  %v1391_v10 = vld [vmem:[#allocation9] ss:$0 sm:$0xff]  ;;  %vm335_vm5 = vcmask 785408   ;;  %vm357_vm6 = vcmask 261120  }
  0x42   :  { %1475 = vmatmul.mubr.msk.f32.vlgmr.msra.gmra.mxu0 %vm106_vm1, %v98_v3  ;;  %1484 = vmatmul.mubr.msk.f32.vlgmr.msra.gmra.mxu1 %vm106_vm1, %v104_v4  ;;  %v1906_v11 = vld [vmem:[%s2119_s4 + $0x18] sm:$0xff]  ;;  %v101_v12 = vld [vmem:[%s2115_s0 + $0x20] sm:$0xff]  ;;  %v1917_v13 = vld [vmem:[%s2119_s4 + $0x10] sm:$0xff] }
  0x43   :  { %1486 = vmatprep.subr.mxu1 %v1794_v7  ;;  %1477 = vmatprep.mubr.msk.f32.mxu0 %vm106_vm1, %v99_v5  ;;  %v102_v14 = vld [vmem:[%s2115_s0 + $0x28] sm:$0xff]  ;;  %v1939_v16 = vld [vmem:[%s2119_s4] sm:$0xff] }
  0x44   :  { %1487 = vmatpush3.msk.msra.mxu1 %vm253_vm2, %v241_v6  ;;  %1488 = vmatprep.mubr.msk.f32.mxu1 %vm1795_vm4, %v1794_v7  ;;  %v1928_v15 = vld [vmem:[%s2119_s4 + $0x8] sm:$0xff]  ;;  %s1797_s4 = smov 96  }
  0x45   :  { %1491 = vmatprep.subr.mxu1 %v1794_v7  ;;  %439 = vrot.lane.b32.xlu0 %v1391_v10, %s1796_s18  ;;  %v1388_v21 = vld [vmem:[#allocation8] ss:$0 sm:$0xff] }
  0x46   :  { %1478 = vmatmul.mubr.msk.f32.gmra.mxu0 %vm106_vm1, %v100_v8  ;;  %1489 = vmatmul.mubr.msk.f32.vlgmr.msra.gmra.mxu1 %vm249_vm3, %v240_v9 }
  0x47   :  { %1492 = vmatpush3.msra.mxu1 %v1906_v11  ;;  %1480 = vmatprep.mubr.msk.f32.mxu0 %vm106_vm1, %v101_v12 }
  0x48   :  { %1493 = vmatprep.subr.mxu1 %v1794_v7  ;;  %1499 = vmatprep.mubr.msk.f32.mxu1 %vm1795_vm4, %v1794_v7 }
  0x49   :  { %1494 = vmatpush3.msra.mxu1 %v1917_v13  ;;  %1502 = vmatprep.subr.mxu0 %v1794_v7 }
  0x4a   :  { %1495 = vmatprep.subr.mxu1 %v1794_v7  ;;  %1481 = vmatmul.mubr.msk.f32.gmra.mxu0 %vm106_vm1, %v102_v14 }
  0x4b   :  { %1496 = vmatpush3.msra.mxu1 %v1928_v15  ;;  %1503 = vmatpush3.msra.mxu0 %v1906_v11 }
  0x4c   :  { %1497 = vmatprep.subr.mxu1 %v1794_v7  ;;  %1504 = vmatprep.subr.mxu0 %v1794_v7 }
  0x4d   :  { %1498 = vmatpush3.msra.mxu1 %v1939_v16  ;;  %1505 = vmatpush3.msra.mxu0 %v1917_v13 }
  0x4e   :  { %1500 = vmatmul.mubr.f32.vlgmr.msra.gmra.mxu1 %v1794_v7  ;;  %1506 = vmatprep.subr.mxu0 %v1794_v7 }
  0x4f   :  { %1507 = vmatpush3.msra.mxu0 %v1928_v15  ;;  %1510 = vmatprep.mubr.msk.f32.mxu0 %vm1795_vm4, %v1794_v7 }
  0x50   :  { %1508 = vmatprep.subr.mxu0 %v1794_v7  ;;  %1513 = vmatprep.subr.mxu1 %v1794_v7 }
  0x51   :  { %1509 = vmatpush3.msra.mxu0 %v1939_v16  ;;  %1514 = vmatpush3.msra.mxu1 %v1906_v11 }
  0x52   :  { %1515 = vmatprep.subr.mxu1 %v1794_v7  ;;  %1521 = vmatprep.mubr.msk.f32.mxu1 %vm1795_vm4, %v1794_v7 }
  0x53   :  { %1516 = vmatpush3.msra.mxu1 %v1917_v13  ;;  %1524 = vmatprep.subr.mxu0 %v1794_v7 }
  0x54   :  { %1517 = vmatprep.subr.mxu1 %v1794_v7 }
  0x55   :  { %1518 = vmatpush3.msra.mxu1 %v1928_v15 }
  0x56   :  { %1519 = vmatprep.subr.mxu1 %v1794_v7 }
  0x57   :  { %1520 = vmatpush3.msra.mxu1 %v1939_v16 }
  0x58   :  { %1535 = vmatprep.subr.mxu1 %v1794_v7 }
  0xb7   :  { %v1972_v36 = vpop.permute.xlu0 %439 }
 0x102   :  { %v1476_v17 = vpop.f32.mrf.mxu0  ;;  %v1485_v18 = vpop.f32.mrf.mxu1 }
 0x104   :  { %v201_v19 = vpop.f32.mrf.mxu0  ;;  %v231_v20 = vpop.f32.mrf.mxu1 }
 0x106   :  { %v1479_v22 = vpop.f32.mrf.mxu0  ;;  %v323_v23 = vpop.f32.mrf.mxu1 }
 0x107   :  { %v324_v24 = vadd.f32 %v1388_v21, %v323_v23 }
 0x108   :  { %v211_v25 = vpop.f32.mrf.mxu0  ;;  %v1490_v26 = vpop.f32.mrf.mxu1 }
 0x109   :  { %v327_v27 = vadd.f32 %v324_v24, %v201_v19  ;;  %v328_v28 = vadd.f32 %v1476_v17, %v324_v24  ;;  %v330_v29 = vadd.f32 %v1479_v22, %v324_v24  ;;  %v333_v30 = vadd.f32 %v324_v24, %v231_v20 }
 0x10a   :  { %v334_v31 = vadd.f32 %v1485_v18, %v324_v24  ;;  %v329_v32 = vadd.f32 %v324_v24, %v211_v25  ;;  %v1482_v33 = vpop.f32.mrf.mxu0 }
 0x10b   :  { %336 = vst.msk [vmem:[#allocation2] sm:$0xff] %vm335_vm5, %v327_v27  ;;  %337 = vst.msk [vmem:[#allocation2 + $0x8] sm:$0xff] %vm335_vm5, %v328_v28  ;;  %v332_v34 = vadd.f32 %v1482_v33, %v324_v24 }
 0x10c   :  { %339 = vst.msk [vmem:[#allocation2 + $0x18] sm:$0xff] %vm335_vm5, %v330_v29  ;;  %342 = vst.msk [vmem:[#allocation2 + $0x30] sm:$0xff] %vm335_vm5, %v333_v30  ;;  %v221_v35 = vpop.f32.mrf.mxu0 }
 0x10d   :  { %338 = vst.msk [vmem:[#allocation2 + $0x10] sm:$0xff] %vm335_vm5, %v329_v32  ;;  %343 = vst.msk [vmem:[#allocation2 + $0x38] sm:$0xff] %vm335_vm5, %v334_v31  ;;  %v331_v37 = vadd.f32 %v324_v24, %v221_v35 }
 0x10e   :  { %341 = vst.msk [vmem:[#allocation2 + $0x28] sm:$0xff] %vm335_vm5, %v332_v34  ;;  %v427_v38 = vpop.f32.mrf.mxu1 }
 0x10f   :  { %340 = vst.msk [vmem:[#allocation2 + $0x20] sm:$0xff] %vm335_vm5, %v331_v37  ;;  %v442_v39 = vadd.f32 %v1972_v36, %v427_v38 }
 0x110   :  { %v1501_v40 = vpop.f32.mrf.mxu1 }
 0x111   :  { %444 = vrot.lane.b32.xlu0 %v442_v39, %s1796_s18 }
 0x112   :  { %v356_v41 = vld [vmem:[#allocation2] sm:$0xff]  ;;  %v463_v61 = vld [vmem:[#allocation2 + $0x8] sm:$0xff] }
 0x113   :  { %v431_v42 = vadd.f32 %v427_v38, %v356_v41 }
 0x114   :  { %v567_v22 = vld [vmem:[#allocation2 + $0x10] sm:$0xff] }
 0x115   :  { %v1392_v43 = vmul.f32 -1.442695, %v431_v42 }
 0x117   :  { %1613 = vpow2.f32 %v1392_v43  ;;  %v671_v43 = vld [vmem:[#allocation2 + $0x18] sm:$0xff] }
 0x124   :  { %v1614_v44 = vpop.eup %1613 }
 0x125   :  { %v435_v45 = vadd.f32 1.0, %v1614_v44 }
 0x127   :  { %1615 = vrcp.f32 %v435_v45 }
 0x134   :  { %v1616_v46 = vpop.eup %1615 }
 0x135   :  { %v454_v52 = vsub.f32 1.0, %v1616_v46  ;;  %v460_v54 = vmul.f32 0.0, %v1616_v46 }
 0x183   :  { %v445_v47 = vpop.permute.xlu0 %444 }
 0x184   :  { %v447_v48 = vmul.f32 %v1616_v46, %v445_v47 }
 0x186   :  { %449 = vrot.lane.b32.xlu1 %v447_v48, %s1796_s18 }
 0x1f8   :  { %v450_v49 = vpop.permute.xlu1 %449 }
 0x1f9   :  { %v452_v50 = vadd.f32 %v450_v49, %v356_v41 }
 0x1fb   :  { %1617 = vtanh.f32 %v452_v50 }
 0x208   :  { %v1618_v51 = vpop.eup %1617 }
 0x209   :  { %456 = vrot.lane.b32.xlu1 %v1618_v51, %s1797_s4 }
 0x27b   :  { %v457_v53 = vpop.permute.xlu1 %456 }
 0x27c   :  { %v459_v55 = vmul.f32 %v457_v53, %v454_v52 }
 0x27e   :  { %v461_v56 = vadd.f32 %v460_v54, %v459_v55 }
 0x280   :  { %465 = vrot.lane.b32.xlu0 %v461_v56, %s1797_s4 }
 0x2f2   :  { %v466_v57 = vpop.permute.xlu0 %465 }
 0x2f3   :  { %1511 = vmatmul.mubr.msk.f32.vlgmr.msra.gmra.mxu0 %vm357_vm6, %v466_v57 }
 0x2f4   :  { %1525 = vmatpush3.msra.mxu0 %v1906_v11  ;;  %1532 = vmatprep.mubr.msk.f32.mxu0 %vm1795_vm4, %v1794_v7 }
 0x2f5   :  { %1526 = vmatprep.subr.mxu0 %v1794_v7 }
 0x2f6   :  { %1527 = vmatpush3.msra.mxu0 %v1917_v13 }
 0x2f7   :  { %1528 = vmatprep.subr.mxu0 %v1794_v7 }
 0x2f8   :  { %1529 = vmatpush3.msra.mxu0 %v1928_v15 }
 0x2f9   :  { %1530 = vmatprep.subr.mxu0 %v1794_v7 }
 0x2fa   :  { %1531 = vmatpush3.msra.mxu0 %v1939_v16 }
 0x2fb   :  { %1546 = vmatprep.subr.mxu0 %v1794_v7 }
 0x3b3   :  { %v535_v58 = vpop.f32.mrf.mxu0 }
 0x3b4   :  { %v546_v59 = vadd.f32 %v535_v58, %v1972_v36  ;;  %v539_v62 = vadd.f32 %v535_v58, %v463_v61 }
 0x3b5   :  { %v1512_v60 = vpop.f32.mrf.mxu0 }
 0x3b6   :  { %548 = vrot.lane.b32.xlu1 %v546_v59, %s1796_s18  ;;  %v1394_v63 = vmul.f32 -1.442695, %v539_v62 }
 0x3b8   :  { %1619 = vpow2.f32 %v1394_v63  ;;  %v775_v63 = vld [vmem:[#allocation2 + $0x20] sm:$0xff] }
 0x3c5   :  { %v1620_v0 = vpop.eup %1619 }
 0x3c6   :  { %v543_v1 = vadd.f32 1.0, %v1620_v0 }
 0x3c8   :  { %1621 = vrcp.f32 %v543_v1 }
 0x3d5   :  { %v1622_v2 = vpop.eup %1621 }
 0x3d6   :  { %v558_v9 = vsub.f32 1.0, %v1622_v2  ;;  %v564_v12 = vmul.f32 %v1622_v2, %v461_v56 }
 0x428   :  { %v549_v3 = vpop.permute.xlu1 %548 }
 0x429   :  { %v551_v4 = vmul.f32 %v1622_v2, %v549_v3 }
 0x42b   :  { %553 = vrot.lane.b32.xlu0 %v551_v4, %s1796_s18 }
 0x49d   :  { %v554_v5 = vpop.permute.xlu0 %553 }
 0x49e   :  { %v556_v6 = vadd.f32 %v554_v5, %v463_v61 }
 0x4a0   :  { %1623 = vtanh.f32 %v556_v6 }
 0x4ad   :  { %v1624_v8 = vpop.eup %1623 }
 0x4ae   :  { %560 = vrot.lane.b32.xlu1 %v1624_v8, %s1797_s4 }
 0x520   :  { %v561_v10 = vpop.permute.xlu1 %560 }
 0x521   :  { %v563_v14 = vmul.f32 %v561_v10, %v558_v9 }
 0x523   :  { %v565_v17 = vadd.f32 %v564_v12, %v563_v14 }
 0x525   :  { %569 = vrot.lane.b32.xlu0 %v565_v17, %s1797_s4 }
 0x597   :  { %v570_v18 = vpop.permute.xlu0 %569 }
 0x598   :  { %1522 = vmatmul.mubr.msk.f32.vlgmr.msra.gmra.mxu1 %vm357_vm6, %v570_v18 }
 0x599   :  { %1536 = vmatpush3.msra.mxu1 %v1906_v11  ;;  %1543 = vmatprep.mubr.msk.f32.mxu1 %vm1795_vm4, %v1794_v7 }
 0x59a   :  { %1537 = vmatprep.subr.mxu1 %v1794_v7 }
 0x59b   :  { %1538 = vmatpush3.msra.mxu1 %v1917_v13 }
 0x59c   :  { %1539 = vmatprep.subr.mxu1 %v1794_v7 }
 0x59d   :  { %1540 = vmatpush3.msra.mxu1 %v1928_v15 }
 0x59e   :  { %1541 = vmatprep.subr.mxu1 %v1794_v7 }
 0x59f   :  { %1542 = vmatpush3.msra.mxu1 %v1939_v16 }
 0x5a0   :  { %1557 = vmatprep.subr.mxu1 %v1794_v7 }
 0x658   :  { %v639_v19 = vpop.f32.mrf.mxu1 }
 0x659   :  { %v650_v20 = vadd.f32 %v639_v19, %v1972_v36  ;;  %v643_v23 = vadd.f32 %v639_v19, %v567_v22 }
 0x65a   :  { %v1523_v21 = vpop.f32.mrf.mxu1 }
 0x65b   :  { %652 = vrot.lane.b32.xlu1 %v650_v20, %s1796_s18  ;;  %v1396_v24 = vmul.f32 -1.442695, %v643_v23  ;;  %v879_v23 = vld [vmem:[#allocation2 + $0x28] sm:$0xff] }
 0x65d   :  { %1625 = vpow2.f32 %v1396_v24 }
 0x66a   :  { %v1626_v25 = vpop.eup %1625 }
 0x66b   :  { %v647_v26 = vadd.f32 1.0, %v1626_v25 }
 0x66d   :  { %1627 = vrcp.f32 %v647_v26 }
 0x67a   :  { %v1628_v27 = vpop.eup %1627 }
 0x67b   :  { %v662_v33 = vsub.f32 1.0, %v1628_v27  ;;  %v668_v35 = vmul.f32 %v1628_v27, %v565_v17 }
 0x6cd   :  { %v653_v28 = vpop.permute.xlu1 %652 }
 0x6ce   :  { %v655_v29 = vmul.f32 %v1628_v27, %v653_v28 }
 0x6d0   :  { %657 = vrot.lane.b32.xlu0 %v655_v29, %s1796_s18 }
 0x742   :  { %v658_v30 = vpop.permute.xlu0 %657 }
 0x743   :  { %v660_v31 = vadd.f32 %v658_v30, %v567_v22 }
 0x745   :  { %1629 = vtanh.f32 %v660_v31 }
 0x752   :  { %v1630_v32 = vpop.eup %1629 }
 0x753   :  { %664 = vrot.lane.b32.xlu1 %v1630_v32, %s1797_s4 }
 0x7c5   :  { %v665_v34 = vpop.permute.xlu1 %664 }
 0x7c6   :  { %v667_v37 = vmul.f32 %v665_v34, %v662_v33 }
 0x7c8   :  { %v669_v38 = vadd.f32 %v668_v35, %v667_v37 }
 0x7ca   :  { %673 = vrot.lane.b32.xlu0 %v669_v38, %s1797_s4 }
 0x83c   :  { %v674_v39 = vpop.permute.xlu0 %673 }
 0x83d   :  { %1533 = vmatmul.mubr.msk.f32.vlgmr.msra.gmra.mxu0 %vm357_vm6, %v674_v39 }
 0x83e   :  { %1547 = vmatpush3.msra.mxu0 %v1906_v11  ;;  %1554 = vmatprep.mubr.msk.f32.mxu0 %vm1795_vm4, %v1794_v7 }
 0x83f   :  { %1548 = vmatprep.subr.mxu0 %v1794_v7 }
 0x840   :  { %1549 = vmatpush3.msra.mxu0 %v1917_v13 }
 0x841   :  { %1550 = vmatprep.subr.mxu0 %v1794_v7 }
 0x842   :  { %1551 = vmatpush3.msra.mxu0 %v1928_v15 }
 0x843   :  { %1552 = vmatprep.subr.mxu0 %v1794_v7 }
 0x844   :  { %1553 = vmatpush3.msra.mxu0 %v1939_v16 }
 0x845   :  { %1568 = vmatprep.subr.mxu0 %v1794_v7 }
 0x8fd   :  { %v743_v40 = vpop.f32.mrf.mxu0 }
 0x8fe   :  { %v754_v41 = vadd.f32 %v743_v40, %v1972_v36  ;;  %v747_v44 = vadd.f32 %v743_v40, %v671_v43 }
 0x8ff   :  { %v1534_v42 = vpop.f32.mrf.mxu0 }
 0x900   :  { %756 = vrot.lane.b32.xlu1 %v754_v41, %s1796_s18  ;;  %v1398_v45 = vmul.f32 -1.442695, %v747_v44  ;;  %v983_v41 = vld [vmem:[#allocation2 + $0x30] sm:$0xff] }
 0x902   :  { %1631 = vpow2.f32 %v1398_v45 }
 0x90f   :  { %v1632_v46 = vpop.eup %1631 }
 0x910   :  { %v751_v47 = vadd.f32 1.0, %v1632_v46 }
 0x912   :  { %1633 = vrcp.f32 %v751_v47 }
 0x91f   :  { %v1634_v48 = vpop.eup %1633 }
 0x920   :  { %v766_v54 = vsub.f32 1.0, %v1634_v48  ;;  %v772_v56 = vmul.f32 %v1634_v48, %v669_v38 }
 0x972   :  { %v757_v49 = vpop.permute.xlu1 %756 }
 0x973   :  { %v759_v50 = vmul.f32 %v1634_v48, %v757_v49 }
 0x975   :  { %761 = vrot.lane.b32.xlu0 %v759_v50, %s1796_s18 }
 0x9e7   :  { %v762_v51 = vpop.permute.xlu0 %761 }
 0x9e8   :  { %v764_v52 = vadd.f32 %v762_v51, %v671_v43 }
 0x9ea   :  { %1635 = vtanh.f32 %v764_v52 }
 0x9f7   :  { %v1636_v53 = vpop.eup %1635 }
 0x9f8   :  { %768 = vrot.lane.b32.xlu1 %v1636_v53, %s1797_s4 }
 0xa6a   :  { %v769_v55 = vpop.permute.xlu1 %768 }
 0xa6b   :  { %v771_v57 = vmul.f32 %v769_v55, %v766_v54 }
 0xa6d   :  { %v773_v58 = vadd.f32 %v772_v56, %v771_v57 }
 0xa6f   :  { %777 = vrot.lane.b32.xlu0 %v773_v58, %s1797_s4 }
 0xae1   :  { %v778_v59 = vpop.permute.xlu0 %777 }
 0xae2   :  { %1544 = vmatmul.mubr.msk.f32.vlgmr.msra.gmra.mxu1 %vm357_vm6, %v778_v59 }
 0xae3   :  { %1558 = vmatpush3.msra.mxu1 %v1906_v11  ;;  %1565 = vmatprep.mubr.msk.f32.mxu1 %vm1795_vm4, %v1794_v7 }
 0xae4   :  { %1559 = vmatprep.subr.mxu1 %v1794_v7 }
 0xae5   :  { %1560 = vmatpush3.msra.mxu1 %v1917_v13 }
 0xae6   :  { %1561 = vmatprep.subr.mxu1 %v1794_v7 }
 0xae7   :  { %1562 = vmatpush3.msra.mxu1 %v1928_v15 }
 0xae8   :  { %1563 = vmatprep.subr.mxu1 %v1794_v7 }
 0xae9   :  { %1564 = vmatpush3.msra.mxu1 %v1939_v16 }
 0xaea   :  { %1579 = vmatprep.subr.mxu1 %v1794_v7 }
 0xba2   :  { %v847_v60 = vpop.f32.mrf.mxu1 }
 0xba3   :  { %v858_v61 = vadd.f32 %v847_v60, %v1972_v36  ;;  %v851_v0 = vadd.f32 %v847_v60, %v775_v63 }
 0xba4   :  { %v1545_v62 = vpop.f32.mrf.mxu1 }
 0xba5   :  { %860 = vrot.lane.b32.xlu1 %v858_v61, %s1796_s18  ;;  %v1400_v1 = vmul.f32 -1.442695, %v851_v0  ;;  %v1087_v61 = vld [vmem:[#allocation2 + $0x38] sm:$0xff] }
 0xba7   :  { %1637 = vpow2.f32 %v1400_v1 }
 0xbb4   :  { %v1638_v2 = vpop.eup %1637 }
 0xbb5   :  { %v855_v3 = vadd.f32 1.0, %v1638_v2 }
 0xbb7   :  { %1639 = vrcp.f32 %v855_v3 }
 0xbc4   :  { %v1640_v4 = vpop.eup %1639 }
 0xbc5   :  { %v870_v12 = vsub.f32 1.0, %v1640_v4  ;;  %v876_v17 = vmul.f32 %v1640_v4, %v773_v58 }
 0xc17   :  { %v861_v5 = vpop.permute.xlu1 %860 }
 0xc18   :  { %v863_v6 = vmul.f32 %v1640_v4, %v861_v5 }
 0xc1a   :  { %865 = vrot.lane.b32.xlu0 %v863_v6, %s1796_s18 }
 0xc8c   :  { %v866_v8 = vpop.permute.xlu0 %865 }
 0xc8d   :  { %v868_v9 = vadd.f32 %v866_v8, %v775_v63  ;;  %v1192_v8 = vld [vmem:[%s2122_s7 + $0x10] sm:$0xff] }
 0xc8f   :  { %1641 = vtanh.f32 %v868_v9  ;;  %v1191_v9 = vld [vmem:[%s2122_s7 + $0x8] sm:$0xff] }
 0xc9c   :  { %v1642_v10 = vpop.eup %1641 }
 0xc9d   :  { %872 = vrot.lane.b32.xlu1 %v1642_v10, %s1797_s4  ;;  %v1190_v10 = vld [vmem:[%s2122_s7] sm:$0xff] }
 0xd0f   :  { %v873_v14 = vpop.permute.xlu1 %872 }
 0xd10   :  { %v875_v18 = vmul.f32 %v873_v14, %v870_v12  ;;  %v1280_v14 = vld [vmem:[%s2124_s9 + $0x18] sm:$0xff] }
 0xd12   :  { %v877_v19 = vadd.f32 %v876_v17, %v875_v18 }
 0xd14   :  { %881 = vrot.lane.b32.xlu0 %v877_v19, %s1797_s4 }
 0xd86   :  { %v882_v20 = vpop.permute.xlu0 %881 }
 0xd87   :  { %1555 = vmatmul.mubr.msk.f32.vlgmr.msra.gmra.mxu0 %vm357_vm6, %v882_v20 }
 0xd88   :  { %1569 = vmatpush3.msra.mxu0 %v1906_v11  ;;  %1576 = vmatprep.mubr.msk.f32.mxu0 %vm1795_vm4, %v1794_v7 }
 0xd89   :  { %1570 = vmatprep.subr.mxu0 %v1794_v7 }
 0xd8a   :  { %1571 = vmatpush3.msra.mxu0 %v1917_v13 }
 0xd8b   :  { %1572 = vmatprep.subr.mxu0 %v1794_v7 }
 0xd8c   :  { %1573 = vmatpush3.msra.mxu0 %v1928_v15 }
 0xd8d   :  { %1574 = vmatprep.subr.mxu0 %v1794_v7 }
 0xd8e   :  { %1575 = vmatpush3.msra.mxu0 %v1939_v16 }
 0xd8f   :  { %1590 = vmatprep.subr.mxu0 %v1794_v7 }
 0xe47   :  { %v951_v21 = vpop.f32.mrf.mxu0 }
 0xe48   :  { %v962_v11 = vadd.f32 %v951_v21, %v1972_v36  ;;  %v955_v24 = vadd.f32 %v951_v21, %v879_v23 }
 0xe49   :  { %v1556_v22 = vpop.f32.mrf.mxu0 }
 0xe4a   :  { %964 = vrot.lane.b32.xlu1 %v962_v11, %s1796_s18  ;;  %v1402_v25 = vmul.f32 -1.442695, %v955_v24  ;;  %v1279_v22 = vld [vmem:[%s2124_s9 + $0x10] sm:$0xff]  ;;  %v1277_v24 = vld [vmem:[%s2124_s9] sm:$0xff] }
 0xe4c   :  { %1643 = vpow2.f32 %v1402_v25  ;;  %v1407_v25 = vld [vmem:[#allocation11] ss:$0 sm:$0xff] }
 0xe59   :  { %v1644_v13 = vpop.eup %1643 }
 0xe5a   :  { %v959_v26 = vadd.f32 1.0, %v1644_v13 }
 0xe5c   :  { %1645 = vrcp.f32 %v959_v26 }
 0xe69   :  { %v1646_v15 = vpop.eup %1645 }
 0xe6a   :  { %v974_v31 = vsub.f32 1.0, %v1646_v15  ;;  %v980_v33 = vmul.f32 %v1646_v15, %v877_v19 }
 0xebc   :  { %v965_v27 = vpop.permute.xlu1 %964 }
 0xebd   :  { %v967_v28 = vmul.f32 %v1646_v15, %v965_v27 }
 0xebf   :  { %969 = vrot.lane.b32.xlu0 %v967_v28, %s1796_s18  ;;  %v1409_v28 = vld [vmem:[%s2125_s10] ss:$0 sm:$0xff] }
 0xf31   :  { %v970_v16 = vpop.permute.xlu0 %969 }
 0xf32   :  { %v972_v29 = vadd.f32 %v970_v16, %v879_v23  ;;  %v1278_v23 = vld [vmem:[%s2124_s9 + $0x8] sm:$0xff] }
 0xf34   :  { %1647 = vtanh.f32 %v972_v29 }
 0xf41   :  { %v1648_v30 = vpop.eup %1647 }
 0xf42   :  { %976 = vrot.lane.b32.xlu1 %v1648_v30, %s1797_s4 }
 0xfb4   :  { %v977_v32 = vpop.permute.xlu1 %976 }
 0xfb5   :  { %v979_v34 = vmul.f32 %v977_v32, %v974_v31 }
 0xfb7   :  { %v981_v35 = vadd.f32 %v980_v33, %v979_v34 }
 0xfb9   :  { %985 = vrot.lane.b32.xlu0 %v981_v35, %s1797_s4 }
0x102b   :  { %v986_v37 = vpop.permute.xlu0 %985 }
0x102c   :  { %1566 = vmatmul.mubr.msk.f32.vlgmr.msra.gmra.mxu1 %vm357_vm6, %v986_v37 }
0x102d   :  { %1587 = vmatprep.mubr.msk.f32.mxu1 %vm1795_vm4, %v1794_v7 }
0x10ec   :  { %v1055_v38 = vpop.f32.mrf.mxu1 }
0x10ed   :  { %v1066_v39 = vadd.f32 %v1055_v38, %v1972_v36  ;;  %v1059_v42 = vadd.f32 %v1055_v38, %v983_v41 }
0x10ee   :  { %v1567_v40 = vpop.f32.mrf.mxu1 }
0x10ef   :  { %1068 = vrot.lane.b32.xlu1 %v1066_v39, %s1796_s18  ;;  %v1404_v43 = vmul.f32 -1.442695, %v1059_v42 }
0x10f1   :  { %1649 = vpow2.f32 %v1404_v43 }
0x10fe   :  { %v1650_v44 = vpop.eup %1649 }
0x10ff   :  { %v1063_v45 = vadd.f32 1.0, %v1650_v44 }
0x1101   :  { %1651 = vrcp.f32 %v1063_v45 }
0x110e   :  { %v1652_v46 = vpop.eup %1651 }
0x110f   :  { %v1078_v52 = vsub.f32 1.0, %v1652_v46  ;;  %v1084_v54 = vmul.f32 %v1652_v46, %v981_v35 }
0x1161   :  { %v1069_v47 = vpop.permute.xlu1 %1068 }
0x1162   :  { %v1071_v48 = vmul.f32 %v1652_v46, %v1069_v47 }
0x1164   :  { %1073 = vrot.lane.b32.xlu0 %v1071_v48, %s1796_s18 }
0x11d6   :  { %v1074_v49 = vpop.permute.xlu0 %1073 }
0x11d7   :  { %v1076_v50 = vadd.f32 %v1074_v49, %v983_v41 }
0x11d9   :  { %1653 = vtanh.f32 %v1076_v50 }
0x11e6   :  { %v1654_v51 = vpop.eup %1653 }
0x11e7   :  { %1080 = vrot.lane.b32.xlu1 %v1654_v51, %s1797_s4 }
0x1259   :  { %v1081_v53 = vpop.permute.xlu1 %1080 }
0x125a   :  { %v1083_v55 = vmul.f32 %v1081_v53, %v1078_v52 }
0x125c   :  { %v1085_v56 = vadd.f32 %v1084_v54, %v1083_v55 }
0x125e   :  { %1089 = vrot.lane.b32.xlu0 %v1085_v56, %s1797_s4 }
0x12d0   :  { %v1090_v57 = vpop.permute.xlu0 %1089 }
0x12d1   :  { %1577 = vmatmul.mubr.msk.f32.vlgmr.msra.gmra.mxu0 %vm357_vm6, %v1090_v57 }
0x12d2   :  { %1598 = vmatprep.mubr.msk.f32.mxu0 %vm1795_vm4, %v1794_v7  ;;  %1591 = vmatpush3.msra.mxu0 %v1280_v14 }
0x12d3   :  { %1592 = vmatprep.subr.mxu0 %v1794_v7 }
0x12d4   :  { %1593 = vmatpush3.msra.mxu0 %v1279_v22 }
0x12d5   :  { %1594 = vmatprep.subr.mxu0 %v1794_v7 }
0x12d6   :  { %1595 = vmatpush3.msra.mxu0 %v1278_v23 }
0x12d7   :  { %1596 = vmatprep.subr.mxu0 %v1794_v7 }
0x12d8   :  { %1597 = vmatpush3.msra.mxu0 %v1277_v24 }
0x1391   :  { %v1159_v58 = vpop.f32.mrf.mxu0 }
0x1392   :  { %v1170_v59 = vadd.f32 %v1159_v58, %v1972_v36  ;;  %v1163_v62 = vadd.f32 %v1159_v58, %v1087_v61  ;;  %v1193_v36 = vld [vmem:[%s2122_s7 + $0x18] sm:$0xff] }
0x1393   :  { %v1578_v60 = vpop.f32.mrf.mxu0  ;;  %1580 = vmatpush3.msra.mxu1 %v1193_v36 }
0x1394   :  { %1172 = vrot.lane.b32.xlu1 %v1170_v59, %s1796_s18  ;;  %v1406_v63 = vmul.f32 -1.442695, %v1163_v62  ;;  %1581 = vmatprep.subr.mxu1 %v1794_v7 }
0x1395   :  { %1582 = vmatpush3.msra.mxu1 %v1192_v8 }
0x1396   :  { %1655 = vpow2.f32 %v1406_v63  ;;  %1583 = vmatprep.subr.mxu1 %v1794_v7 }
0x1397   :  { %1584 = vmatpush3.msra.mxu1 %v1191_v9 }
0x1398   :  { %1585 = vmatprep.subr.mxu1 %v1794_v7 }
0x1399   :  { %1586 = vmatpush3.msra.mxu1 %v1190_v10 }
0x13a3   :  { %v1656_v0 = vpop.eup %1655 }
0x13a4   :  { %v1167_v1 = vadd.f32 1.0, %v1656_v0 }
0x13a6   :  { %1657 = vrcp.f32 %v1167_v1 }
0x13b3   :  { %v1658_v2 = vpop.eup %1657 }
0x13b4   :  { %v1182_v17 = vsub.f32 1.0, %v1658_v2  ;;  %v1188_v19 = vmul.f32 %v1658_v2, %v1085_v56 }
0x1406   :  { %v1173_v3 = vpop.permute.xlu1 %1172 }
0x1407   :  { %v1175_v4 = vmul.f32 %v1658_v2, %v1173_v3 }
0x1409   :  { %1177 = vrot.lane.b32.xlu0 %v1175_v4, %s1796_s18  ;;  %s1798_s18 = smov [#allocation12]  }
0x140a   :  { %s1368_s1 = sshll.u32 %s1798_s18, 4  ;;  %s1369_s1 = int_to_ptr.vmem [resolvable:$true] %s1368_s1 }
0x140b   :  { %s1761_s9 = scalar_lea.vmem %s1369_s1, 128  ;;  %p1766_p12 = scmp.lt.s32.totalorder %s1369_s1, %s1369_s1 }
0x140c   :  { %p1762_p11 = scmp.ne.s32.totalorder %s1369_s1, %s1761_s9  ;;  %p1767_p13 = scmp.lt.s32.totalorder %s1761_s9, %s1761_s9 }
0x140e   :  { %p1768_p0 = por %p1767_p13, %p1766_p12 }
0x1410   :  { %p1769_p1 = pnand %p1768_p0, %p1762_p11 }
0x147b   :  { %v1178_v5 = vpop.permute.xlu0 %1177 }
0x147c   :  { %v1180_v6 = vadd.f32 %v1178_v5, %v1087_v61 }
0x147e   :  { %1659 = vtanh.f32 %v1180_v6 }
0x148b   :  { %v1660_v12 = vpop.eup %1659 }
0x148c   :  { %1184 = vrot.lane.b32.xlu1 %v1660_v12, %s1797_s4 }
0x14fe   :  { %v1185_v18 = vpop.permute.xlu1 %1184 }
0x14ff   :  { %v1187_v20 = vmul.f32 %v1185_v18, %v1182_v17 }
0x1501   :  { %v1189_v21 = vadd.f32 %v1188_v19, %v1187_v20 }
0x1503   :  { %1202 = vrot.lane.b32.xlu0 %v1189_v21, %s1797_s4 }
0x1575   :  { %v1203_v11 = vpop.permute.xlu0 %1202 }
0x1576   :  { %1588 = vmatmul.mubr.msk.f32.vlgmr.msra.gmra.mxu1 %vm357_vm6, %v1203_v11 }
0x1636   :  { %v1272_v13 = vpop.f32.mrf.mxu1 }
0x1637   :  { %v1273_v26 = vadd.f32 %v1407_v25, %v1272_v13 }
0x1638   :  { %v1589_v15 = vpop.f32.mrf.mxu1 }
0x1639   :  { %v1276_v27 = vmax.f32 %v1273_v26, 0.0 }
0x163b   :  { %1599 = vmatmul.mubr.msk.f32.vlgmr.msra.gmra.mxu0 %vm357_vm6, %v1276_v27 }
0x16fb   :  { %v1357_v16 = vpop.f32.mrf.mxu0 }
0x16fc   :  { %v1358_v7 = vadd.f32 %v1409_v28, %v1357_v16 }
0x16fd   :  { %v1600_v29 = vpop.f32.mrf.mxu0 }
0x16fe   :  { %1361 = vst [vmem:[#allocation12] sm:$0xff] %v1358_v7 }
0x16ff   :  { %1772 = shalt.err (!%p1769_p1)
}
0x1700   :  { %1371 = dma.vmem_to_hbm [thread:$0]  %s1369_s1, 128, %s2126_s11, [#allocation5]  }
0x1701   :  { %1787 = dma.done.wait [#allocation5], 128  }
0x1702   :  { %1788 = vsyncadd [#allocation5], 4294967168 }
0x1703   :  { %1375 = vsyncpa [#allocation4], 1 }
0x1704   :  { %1376 = vsyncpa [#allocation7], 1 }
0x1705   :  { %1377 = vsyncpa [#allocation10], 1 }
0x1706   :  { %1378 = vsyncpa [#allocation5], 1 }

</bundles_post_ra>
